<compile_context>
chip_gen: v6e
topology: v6e:2x2x1
jax: 0.10.0
libtpu: 0.0.40
codegen_flags: <defaults>
</compile_context>

<pallas_src>
import functools

import jax
import jax.numpy as jnp
from jax.experimental import pallas as pl
from jax.experimental.pallas import tpu as pltpu


def _gather_rows_kernel(tn, ids_ref, table_hbm, out_ref, sems):
    """Gather `tn` embedding rows for this grid step via direct HBM->VMEM DMA.

    ids_ref:   SMEM (n_pad,) int32  -- all token ids (scalar-prefetched)
    table_hbm: HBM  (vsz, dsz) f32  -- embedding table, left in place (pl.ANY)
    out_ref:   VMEM (tn, dsz) f32   -- output block for this grid step
    sems:      DMA semaphores (tn,)
    """
    base = pl.program_id(0) * tn
    copies = []
    # Static unroll: launch tn row-DMAs concurrently, then wait on all of them.
    for j in range(tn):
        row = ids_ref[base + j]                       # dynamic SMEM scalar read
        cp = pltpu.make_async_copy(
            table_hbm.at[pl.ds(row, 1), :],           # one (1, dsz) row in HBM
            out_ref.at[pl.ds(j, 1), :],               # row j of the output block
            sems.at[j],
        )
        cp.start()
        copies.append(cp)
    for cp in copies:
        cp.wait()


def lookup_table_embeddings(x, table, *, tn=8):
    """Pallas equivalent of LookupTableEmbeddings.forward(x).

    x:     [B, T] integer token ids
    table: [vsz, dsz] float32 embedding weights (row 0 == 0 for padding_idx=0)
    tn:    tokens gathered per grid step (tunable; more rows per step amortizes
           per-step overhead at the cost of more in-flight DMAs)
    returns [B, T, dsz] float32
    """
    B, T = x.shape
    vsz, dsz = table.shape
    n = B * T
    n_pad = pl.cdiv(n, tn) * tn

    # Clamp ids (a gather-by-index would otherwise read OOB for bad ids) and pad
    # the token stream up to a multiple of tn; padded slots read row 0.
    ids = jnp.clip(x.reshape(n).astype(jnp.int32), 0, vsz - 1)
    ids = jnp.pad(ids, (0, n_pad - n))

    out = pl.pallas_call(
        functools.partial(_gather_rows_kernel, tn),
        out_shape=jax.ShapeDtypeStruct((n_pad, dsz), table.dtype),
        grid_spec=pltpu.PrefetchScalarGridSpec(
            num_scalar_prefetch=1,                       # ids -> SMEM
            grid=(n_pad // tn,),
            in_specs=[
                pl.BlockSpec(memory_space=pl.ANY),       # table stays in HBM
            ],
            out_specs=pl.BlockSpec((tn, dsz), lambda i, ids: (i, 0)),
            scratch_shapes=[pltpu.SemaphoreType.DMA((tn,))],
        ),
        compiler_params=pltpu.CompilerParams(
            # Token blocks are independent -> shard across TCs on v7x megacore.
            dimension_semantics=("parallel",),
        ),
    )(ids, table)

    # TODO(synk): for real models with dsz < 128 consider fusing rows/heads so the
    # output lane dim is a multiple of 128 (avoids masked partial stores).
    return out[:n].reshape(B, T, dsz)


def make_embedding_table(key, vsz, dsz):
    """Deterministic init matching nn.Embedding(vsz, dsz, padding_idx=0):
    N(0,1) weights with row 0 zeroed."""
    w = jax.random.normal(key, (vsz, dsz), dtype=jnp.float32)
    w = w.at[0].set(0.0)
    return w


if __name__ == "__main__":
    key = jax.random.PRNGKey(0)
    k_w, k_x = jax.random.split(key)

    vsz, dsz = 32, 32
    B, T = 2, 8

    table = make_embedding_table(k_w, vsz, dsz)
    # token ids in [0, vsz); include some 0s to exercise padding_idx behavior
    x = jax.random.randint(k_x, (B, T), 0, vsz, dtype=jnp.int32)

    out = lookup_table_embeddings(x, table)
    out = jax.block_until_ready(out)

    # reference: plain gather
    ref = jnp.take(table, x, axis=0)
    assert out.shape == (B, T, dsz), out.shape
    assert jnp.allclose(out, ref, atol=1e-6), "mismatch vs reference gather"

    print("KERNEL_OK")
</pallas_src>

<mosaic_0001>
module attributes {stable_mosaic.version = 11 : i64} {
  func.func @_gather_rows_kernel(%arg0: i32, %arg1: memref<16xi32, #tpu.memory_space<smem>>, %arg2: memref<32x32xf32, #tpu.memory_space<any>>, %arg3: memref<8x32xf32, #tpu.memory_space<vmem>>, %arg4: memref<8x!tpu.dma_semaphore, #tpu.memory_space<semaphore_mem>>) attributes {dimension_semantics = [#tpu.dimension_semantics<parallel>], iteration_bounds = array<i64: 2>, scalar_prefetch = 1 : i64, scratch_operands = 1 : i64, tpu.core_type = #tpu.core_type<tc>, window_params = [{}, {transform_indices = @transform_1, window_bounds = array<i64: 8, 32>}]} {
    %c8_i32 = arith.constant 8 : i32
    %0 = arith.muli %arg0, %c8_i32 : i32
    %c0_i32 = arith.constant 0 : i32
    %1 = arith.addi %0, %c0_i32 : i32
    %2 = arith.index_cast %1 : i32 to index
    %3 = memref.load %arg1[%2] : memref<16xi32, #tpu.memory_space<smem>>
    %c0_i32_0 = arith.constant 0 : i32
    %c0_i32_1 = arith.constant 0 : i32
    %4 = tpu.memref_slice %arg2[%3, %c0_i32_1] : memref<32x32xf32, #tpu.memory_space<any>> -> memref<1x32xf32, #tpu.memory_space<any>>
    %c0_i32_2 = arith.constant 0 : i32
    %c0_i32_3 = arith.constant 0 : i32
    %5 = tpu.memref_slice %arg3[%c0_i32_2, %c0_i32_3] : memref<8x32xf32, #tpu.memory_space<vmem>> -> memref<1x32xf32, #tpu.memory_space<vmem>>
    %6 = tpu.memref_slice %arg4[%c0_i32_0] : memref<8x!tpu.dma_semaphore, #tpu.memory_space<semaphore_mem>> -> memref<1x!tpu.dma_semaphore, #tpu.memory_space<semaphore_mem>>
    %7 = tpu.memref_squeeze %6 : memref<1x!tpu.dma_semaphore, #tpu.memory_space<semaphore_mem>> -> memref<!tpu.dma_semaphore, #tpu.memory_space<semaphore_mem>>
    tpu.enqueue_dma source(%4 : memref<1x32xf32, #tpu.memory_space<any>>) target(%5 : memref<1x32xf32, #tpu.memory_space<vmem>>) target_semaphore(%7 : memref<!tpu.dma_semaphore, #tpu.memory_space<semaphore_mem>>)
    %c1_i32 = arith.constant 1 : i32
    %8 = arith.addi %0, %c1_i32 : i32
    %9 = arith.index_cast %8 : i32 to index
    %10 = memref.load %arg1[%9] : memref<16xi32, #tpu.memory_space<smem>>
    %c1_i32_4 = arith.constant 1 : i32
    %c0_i32_5 = arith.constant 0 : i32
    %11 = tpu.memref_slice %arg2[%10, %c0_i32_5] : memref<32x32xf32, #tpu.memory_space<any>> -> memref<1x32xf32, #tpu.memory_space<any>>
    %c1_i32_6 = arith.constant 1 : i32
    %c0_i32_7 = arith.constant 0 : i32
    %12 = tpu.memref_slice %arg3[%c1_i32_6, %c0_i32_7] : memref<8x32xf32, #tpu.memory_space<vmem>> -> memref<1x32xf32, #tpu.memory_space<vmem>>
    %13 = tpu.memref_slice %arg4[%c1_i32_4] : memref<8x!tpu.dma_semaphore, #tpu.memory_space<semaphore_mem>> -> memref<1x!tpu.dma_semaphore, #tpu.memory_space<semaphore_mem>>
    %14 = tpu.memref_squeeze %13 : memref<1x!tpu.dma_semaphore, #tpu.memory_space<semaphore_mem>> -> memref<!tpu.dma_semaphore, #tpu.memory_space<semaphore_mem>>
    tpu.enqueue_dma source(%11 : memref<1x32xf32, #tpu.memory_space<any>>) target(%12 : memref<1x32xf32, #tpu.memory_space<vmem>>) target_semaphore(%14 : memref<!tpu.dma_semaphore, #tpu.memory_space<semaphore_mem>>)
    %c2_i32 = arith.constant 2 : i32
    %15 = arith.addi %0, %c2_i32 : i32
    %16 = arith.index_cast %15 : i32 to index
    %17 = memref.load %arg1[%16] : memref<16xi32, #tpu.memory_space<smem>>
    %c2_i32_8 = arith.constant 2 : i32
    %c0_i32_9 = arith.constant 0 : i32
    %18 = tpu.memref_slice %arg2[%17, %c0_i32_9] : memref<32x32xf32, #tpu.memory_space<any>> -> memref<1x32xf32, #tpu.memory_space<any>>
    %c2_i32_10 = arith.constant 2 : i32
    %c0_i32_11 = arith.constant 0 : i32
    %19 = tpu.memref_slice %arg3[%c2_i32_10, %c0_i32_11] : memref<8x32xf32, #tpu.memory_space<vmem>> -> memref<1x32xf32, #tpu.memory_space<vmem>>
    %20 = tpu.memref_slice %arg4[%c2_i32_8] : memref<8x!tpu.dma_semaphore, #tpu.memory_space<semaphore_mem>> -> memref<1x!tpu.dma_semaphore, #tpu.memory_space<semaphore_mem>>
    %21 = tpu.memref_squeeze %20 : memref<1x!tpu.dma_semaphore, #tpu.memory_space<semaphore_mem>> -> memref<!tpu.dma_semaphore, #tpu.memory_space<semaphore_mem>>
    tpu.enqueue_dma source(%18 : memref<1x32xf32, #tpu.memory_space<any>>) target(%19 : memref<1x32xf32, #tpu.memory_space<vmem>>) target_semaphore(%21 : memref<!tpu.dma_semaphore, #tpu.memory_space<semaphore_mem>>)
    %c3_i32 = arith.constant 3 : i32
    %22 = arith.addi %0, %c3_i32 : i32
    %23 = arith.index_cast %22 : i32 to index
    %24 = memref.load %arg1[%23] : memref<16xi32, #tpu.memory_space<smem>>
    %c3_i32_12 = arith.constant 3 : i32
    %c0_i32_13 = arith.constant 0 : i32
    %25 = tpu.memref_slice %arg2[%24, %c0_i32_13] : memref<32x32xf32, #tpu.memory_space<any>> -> memref<1x32xf32, #tpu.memory_space<any>>
    %c3_i32_14 = arith.constant 3 : i32
    %c0_i32_15 = arith.constant 0 : i32
    %26 = tpu.memref_slice %arg3[%c3_i32_14, %c0_i32_15] : memref<8x32xf32, #tpu.memory_space<vmem>> -> memref<1x32xf32, #tpu.memory_space<vmem>>
    %27 = tpu.memref_slice %arg4[%c3_i32_12] : memref<8x!tpu.dma_semaphore, #tpu.memory_space<semaphore_mem>> -> memref<1x!tpu.dma_semaphore, #tpu.memory_space<semaphore_mem>>
    %28 = tpu.memref_squeeze %27 : memref<1x!tpu.dma_semaphore, #tpu.memory_space<semaphore_mem>> -> memref<!tpu.dma_semaphore, #tpu.memory_space<semaphore_mem>>
    tpu.enqueue_dma source(%25 : memref<1x32xf32, #tpu.memory_space<any>>) target(%26 : memref<1x32xf32, #tpu.memory_space<vmem>>) target_semaphore(%28 : memref<!tpu.dma_semaphore, #tpu.memory_space<semaphore_mem>>)
    %c4_i32 = arith.constant 4 : i32
    %29 = arith.addi %0, %c4_i32 : i32
    %30 = arith.index_cast %29 : i32 to index
    %31 = memref.load %arg1[%30] : memref<16xi32, #tpu.memory_space<smem>>
    %c4_i32_16 = arith.constant 4 : i32
    %c0_i32_17 = arith.constant 0 : i32
    %32 = tpu.memref_slice %arg2[%31, %c0_i32_17] : memref<32x32xf32, #tpu.memory_space<any>> -> memref<1x32xf32, #tpu.memory_space<any>>
    %c4_i32_18 = arith.constant 4 : i32
    %c0_i32_19 = arith.constant 0 : i32
    %33 = tpu.memref_slice %arg3[%c4_i32_18, %c0_i32_19] : memref<8x32xf32, #tpu.memory_space<vmem>> -> memref<1x32xf32, #tpu.memory_space<vmem>>
    %34 = tpu.memref_slice %arg4[%c4_i32_16] : memref<8x!tpu.dma_semaphore, #tpu.memory_space<semaphore_mem>> -> memref<1x!tpu.dma_semaphore, #tpu.memory_space<semaphore_mem>>
    %35 = tpu.memref_squeeze %34 : memref<1x!tpu.dma_semaphore, #tpu.memory_space<semaphore_mem>> -> memref<!tpu.dma_semaphore, #tpu.memory_space<semaphore_mem>>
    tpu.enqueue_dma source(%32 : memref<1x32xf32, #tpu.memory_space<any>>) target(%33 : memref<1x32xf32, #tpu.memory_space<vmem>>) target_semaphore(%35 : memref<!tpu.dma_semaphore, #tpu.memory_space<semaphore_mem>>)
    %c5_i32 = arith.constant 5 : i32
    %36 = arith.addi %0, %c5_i32 : i32
    %37 = arith.index_cast %36 : i32 to index
    %38 = memref.load %arg1[%37] : memref<16xi32, #tpu.memory_space<smem>>
    %c5_i32_20 = arith.constant 5 : i32
    %c0_i32_21 = arith.constant 0 : i32
    %39 = tpu.memref_slice %arg2[%38, %c0_i32_21] : memref<32x32xf32, #tpu.memory_space<any>> -> memref<1x32xf32, #tpu.memory_space<any>>
    %c5_i32_22 = arith.constant 5 : i32
    %c0_i32_23 = arith.constant 0 : i32
    %40 = tpu.memref_slice %arg3[%c5_i32_22, %c0_i32_23] : memref<8x32xf32, #tpu.memory_space<vmem>> -> memref<1x32xf32, #tpu.memory_space<vmem>>
    %41 = tpu.memref_slice %arg4[%c5_i32_20] : memref<8x!tpu.dma_semaphore, #tpu.memory_space<semaphore_mem>> -> memref<1x!tpu.dma_semaphore, #tpu.memory_space<semaphore_mem>>
    %42 = tpu.memref_squeeze %41 : memref<1x!tpu.dma_semaphore, #tpu.memory_space<semaphore_mem>> -> memref<!tpu.dma_semaphore, #tpu.memory_space<semaphore_mem>>
    tpu.enqueue_dma source(%39 : memref<1x32xf32, #tpu.memory_space<any>>) target(%40 : memref<1x32xf32, #tpu.memory_space<vmem>>) target_semaphore(%42 : memref<!tpu.dma_semaphore, #tpu.memory_space<semaphore_mem>>)
    %c6_i32 = arith.constant 6 : i32
    %43 = arith.addi %0, %c6_i32 : i32
    %44 = arith.index_cast %43 : i32 to index
    %45 = memref.load %arg1[%44] : memref<16xi32, #tpu.memory_space<smem>>
    %c6_i32_24 = arith.constant 6 : i32
    %c0_i32_25 = arith.constant 0 : i32
    %46 = tpu.memref_slice %arg2[%45, %c0_i32_25] : memref<32x32xf32, #tpu.memory_space<any>> -> memref<1x32xf32, #tpu.memory_space<any>>
    %c6_i32_26 = arith.constant 6 : i32
    %c0_i32_27 = arith.constant 0 : i32
    %47 = tpu.memref_slice %arg3[%c6_i32_26, %c0_i32_27] : memref<8x32xf32, #tpu.memory_space<vmem>> -> memref<1x32xf32, #tpu.memory_space<vmem>>
    %48 = tpu.memref_slice %arg4[%c6_i32_24] : memref<8x!tpu.dma_semaphore, #tpu.memory_space<semaphore_mem>> -> memref<1x!tpu.dma_semaphore, #tpu.memory_space<semaphore_mem>>
    %49 = tpu.memref_squeeze %48 : memref<1x!tpu.dma_semaphore, #tpu.memory_space<semaphore_mem>> -> memref<!tpu.dma_semaphore, #tpu.memory_space<semaphore_mem>>
    tpu.enqueue_dma source(%46 : memref<1x32xf32, #tpu.memory_space<any>>) target(%47 : memref<1x32xf32, #tpu.memory_space<vmem>>) target_semaphore(%49 : memref<!tpu.dma_semaphore, #tpu.memory_space<semaphore_mem>>)
    %c7_i32 = arith.constant 7 : i32
    %50 = arith.addi %0, %c7_i32 : i32
    %51 = arith.index_cast %50 : i32 to index
    %52 = memref.load %arg1[%51] : memref<16xi32, #tpu.memory_space<smem>>
    %c7_i32_28 = arith.constant 7 : i32
    %c0_i32_29 = arith.constant 0 : i32
    %53 = tpu.memref_slice %arg2[%52, %c0_i32_29] : memref<32x32xf32, #tpu.memory_space<any>> -> memref<1x32xf32, #tpu.memory_space<any>>
    %c7_i32_30 = arith.constant 7 : i32
    %c0_i32_31 = arith.constant 0 : i32
    %54 = tpu.memref_slice %arg3[%c7_i32_30, %c0_i32_31] : memref<8x32xf32, #tpu.memory_space<vmem>> -> memref<1x32xf32, #tpu.memory_space<vmem>>
    %55 = tpu.memref_slice %arg4[%c7_i32_28] : memref<8x!tpu.dma_semaphore, #tpu.memory_space<semaphore_mem>> -> memref<1x!tpu.dma_semaphore, #tpu.memory_space<semaphore_mem>>
    %56 = tpu.memref_squeeze %55 : memref<1x!tpu.dma_semaphore, #tpu.memory_space<semaphore_mem>> -> memref<!tpu.dma_semaphore, #tpu.memory_space<semaphore_mem>>
    tpu.enqueue_dma source(%53 : memref<1x32xf32, #tpu.memory_space<any>>) target(%54 : memref<1x32xf32, #tpu.memory_space<vmem>>) target_semaphore(%56 : memref<!tpu.dma_semaphore, #tpu.memory_space<semaphore_mem>>)
    %c0_i32_32 = arith.constant 0 : i32
    %c0_i32_33 = arith.constant 0 : i32
    %57 = tpu.memref_slice %arg2[%3, %c0_i32_33] : memref<32x32xf32, #tpu.memory_space<any>> -> memref<1x32xf32, #tpu.memory_space<any>>
    %c0_i32_34 = arith.constant 0 : i32
    %c0_i32_35 = arith.constant 0 : i32
    %58 = tpu.memref_slice %arg3[%c0_i32_34, %c0_i32_35] : memref<8x32xf32, #tpu.memory_space<vmem>> -> memref<1x32xf32, #tpu.memory_space<vmem>>
    %59 = tpu.memref_slice %arg4[%c0_i32_32] : memref<8x!tpu.dma_semaphore, #tpu.memory_space<semaphore_mem>> -> memref<1x!tpu.dma_semaphore, #tpu.memory_space<semaphore_mem>>
    %60 = tpu.memref_squeeze %59 : memref<1x!tpu.dma_semaphore, #tpu.memory_space<semaphore_mem>> -> memref<!tpu.dma_semaphore, #tpu.memory_space<semaphore_mem>>
    tpu.wait_dma2 semaphore(%60 : memref<!tpu.dma_semaphore, #tpu.memory_space<semaphore_mem>>) src(%57 : memref<1x32xf32, #tpu.memory_space<any>>) dst(%58 : memref<1x32xf32, #tpu.memory_space<vmem>>)
    %c1_i32_36 = arith.constant 1 : i32
    %c0_i32_37 = arith.constant 0 : i32
    %61 = tpu.memref_slice %arg2[%10, %c0_i32_37] : memref<32x32xf32, #tpu.memory_space<any>> -> memref<1x32xf32, #tpu.memory_space<any>>
    %c1_i32_38 = arith.constant 1 : i32
    %c0_i32_39 = arith.constant 0 : i32
    %62 = tpu.memref_slice %arg3[%c1_i32_38, %c0_i32_39] : memref<8x32xf32, #tpu.memory_space<vmem>> -> memref<1x32xf32, #tpu.memory_space<vmem>>
    %63 = tpu.memref_slice %arg4[%c1_i32_36] : memref<8x!tpu.dma_semaphore, #tpu.memory_space<semaphore_mem>> -> memref<1x!tpu.dma_semaphore, #tpu.memory_space<semaphore_mem>>
    %64 = tpu.memref_squeeze %63 : memref<1x!tpu.dma_semaphore, #tpu.memory_space<semaphore_mem>> -> memref<!tpu.dma_semaphore, #tpu.memory_space<semaphore_mem>>
    tpu.wait_dma2 semaphore(%64 : memref<!tpu.dma_semaphore, #tpu.memory_space<semaphore_mem>>) src(%61 : memref<1x32xf32, #tpu.memory_space<any>>) dst(%62 : memref<1x32xf32, #tpu.memory_space<vmem>>)
    %c2_i32_40 = arith.constant 2 : i32
    %c0_i32_41 = arith.constant 0 : i32
    %65 = tpu.memref_slice %arg2[%17, %c0_i32_41] : memref<32x32xf32, #tpu.memory_space<any>> -> memref<1x32xf32, #tpu.memory_space<any>>
    %c2_i32_42 = arith.constant 2 : i32
    %c0_i32_43 = arith.constant 0 : i32
    %66 = tpu.memref_slice %arg3[%c2_i32_42, %c0_i32_43] : memref<8x32xf32, #tpu.memory_space<vmem>> -> memref<1x32xf32, #tpu.memory_space<vmem>>
    %67 = tpu.memref_slice %arg4[%c2_i32_40] : memref<8x!tpu.dma_semaphore, #tpu.memory_space<semaphore_mem>> -> memref<1x!tpu.dma_semaphore, #tpu.memory_space<semaphore_mem>>
    %68 = tpu.memref_squeeze %67 : memref<1x!tpu.dma_semaphore, #tpu.memory_space<semaphore_mem>> -> memref<!tpu.dma_semaphore, #tpu.memory_space<semaphore_mem>>
    tpu.wait_dma2 semaphore(%68 : memref<!tpu.dma_semaphore, #tpu.memory_space<semaphore_mem>>) src(%65 : memref<1x32xf32, #tpu.memory_space<any>>) dst(%66 : memref<1x32xf32, #tpu.memory_space<vmem>>)
    %c3_i32_44 = arith.constant 3 : i32
    %c0_i32_45 = arith.constant 0 : i32
    %69 = tpu.memref_slice %arg2[%24, %c0_i32_45] : memref<32x32xf32, #tpu.memory_space<any>> -> memref<1x32xf32, #tpu.memory_space<any>>
    %c3_i32_46 = arith.constant 3 : i32
    %c0_i32_47 = arith.constant 0 : i32
    %70 = tpu.memref_slice %arg3[%c3_i32_46, %c0_i32_47] : memref<8x32xf32, #tpu.memory_space<vmem>> -> memref<1x32xf32, #tpu.memory_space<vmem>>
    %71 = tpu.memref_slice %arg4[%c3_i32_44] : memref<8x!tpu.dma_semaphore, #tpu.memory_space<semaphore_mem>> -> memref<1x!tpu.dma_semaphore, #tpu.memory_space<semaphore_mem>>
    %72 = tpu.memref_squeeze %71 : memref<1x!tpu.dma_semaphore, #tpu.memory_space<semaphore_mem>> -> memref<!tpu.dma_semaphore, #tpu.memory_space<semaphore_mem>>
    tpu.wait_dma2 semaphore(%72 : memref<!tpu.dma_semaphore, #tpu.memory_space<semaphore_mem>>) src(%69 : memref<1x32xf32, #tpu.memory_space<any>>) dst(%70 : memref<1x32xf32, #tpu.memory_space<vmem>>)
    %c4_i32_48 = arith.constant 4 : i32
    %c0_i32_49 = arith.constant 0 : i32
    %73 = tpu.memref_slice %arg2[%31, %c0_i32_49] : memref<32x32xf32, #tpu.memory_space<any>> -> memref<1x32xf32, #tpu.memory_space<any>>
    %c4_i32_50 = arith.constant 4 : i32
    %c0_i32_51 = arith.constant 0 : i32
    %74 = tpu.memref_slice %arg3[%c4_i32_50, %c0_i32_51] : memref<8x32xf32, #tpu.memory_space<vmem>> -> memref<1x32xf32, #tpu.memory_space<vmem>>
    %75 = tpu.memref_slice %arg4[%c4_i32_48] : memref<8x!tpu.dma_semaphore, #tpu.memory_space<semaphore_mem>> -> memref<1x!tpu.dma_semaphore, #tpu.memory_space<semaphore_mem>>
    %76 = tpu.memref_squeeze %75 : memref<1x!tpu.dma_semaphore, #tpu.memory_space<semaphore_mem>> -> memref<!tpu.dma_semaphore, #tpu.memory_space<semaphore_mem>>
    tpu.wait_dma2 semaphore(%76 : memref<!tpu.dma_semaphore, #tpu.memory_space<semaphore_mem>>) src(%73 : memref<1x32xf32, #tpu.memory_space<any>>) dst(%74 : memref<1x32xf32, #tpu.memory_space<vmem>>)
    %c5_i32_52 = arith.constant 5 : i32
    %c0_i32_53 = arith.constant 0 : i32
    %77 = tpu.memref_slice %arg2[%38, %c0_i32_53] : memref<32x32xf32, #tpu.memory_space<any>> -> memref<1x32xf32, #tpu.memory_space<any>>
    %c5_i32_54 = arith.constant 5 : i32
    %c0_i32_55 = arith.constant 0 : i32
    %78 = tpu.memref_slice %arg3[%c5_i32_54, %c0_i32_55] : memref<8x32xf32, #tpu.memory_space<vmem>> -> memref<1x32xf32, #tpu.memory_space<vmem>>
    %79 = tpu.memref_slice %arg4[%c5_i32_52] : memref<8x!tpu.dma_semaphore, #tpu.memory_space<semaphore_mem>> -> memref<1x!tpu.dma_semaphore, #tpu.memory_space<semaphore_mem>>
    %80 = tpu.memref_squeeze %79 : memref<1x!tpu.dma_semaphore, #tpu.memory_space<semaphore_mem>> -> memref<!tpu.dma_semaphore, #tpu.memory_space<semaphore_mem>>
    tpu.wait_dma2 semaphore(%80 : memref<!tpu.dma_semaphore, #tpu.memory_space<semaphore_mem>>) src(%77 : memref<1x32xf32, #tpu.memory_space<any>>) dst(%78 : memref<1x32xf32, #tpu.memory_space<vmem>>)
    %c6_i32_56 = arith.constant 6 : i32
    %c0_i32_57 = arith.constant 0 : i32
    %81 = tpu.memref_slice %arg2[%45, %c0_i32_57] : memref<32x32xf32, #tpu.memory_space<any>> -> memref<1x32xf32, #tpu.memory_space<any>>
    %c6_i32_58 = arith.constant 6 : i32
    %c0_i32_59 = arith.constant 0 : i32
    %82 = tpu.memref_slice %arg3[%c6_i32_58, %c0_i32_59] : memref<8x32xf32, #tpu.memory_space<vmem>> -> memref<1x32xf32, #tpu.memory_space<vmem>>
    %83 = tpu.memref_slice %arg4[%c6_i32_56] : memref<8x!tpu.dma_semaphore, #tpu.memory_space<semaphore_mem>> -> memref<1x!tpu.dma_semaphore, #tpu.memory_space<semaphore_mem>>
    %84 = tpu.memref_squeeze %83 : memref<1x!tpu.dma_semaphore, #tpu.memory_space<semaphore_mem>> -> memref<!tpu.dma_semaphore, #tpu.memory_space<semaphore_mem>>
    tpu.wait_dma2 semaphore(%84 : memref<!tpu.dma_semaphore, #tpu.memory_space<semaphore_mem>>) src(%81 : memref<1x32xf32, #tpu.memory_space<any>>) dst(%82 : memref<1x32xf32, #tpu.memory_space<vmem>>)
    %c7_i32_60 = arith.constant 7 : i32
    %c0_i32_61 = arith.constant 0 : i32
    %85 = tpu.memref_slice %arg2[%52, %c0_i32_61] : memref<32x32xf32, #tpu.memory_space<any>> -> memref<1x32xf32, #tpu.memory_space<any>>
    %c7_i32_62 = arith.constant 7 : i32
    %c0_i32_63 = arith.constant 0 : i32
    %86 = tpu.memref_slice %arg3[%c7_i32_62, %c0_i32_63] : memref<8x32xf32, #tpu.memory_space<vmem>> -> memref<1x32xf32, #tpu.memory_space<vmem>>
    %87 = tpu.memref_slice %arg4[%c7_i32_60] : memref<8x!tpu.dma_semaphore, #tpu.memory_space<semaphore_mem>> -> memref<1x!tpu.dma_semaphore, #tpu.memory_space<semaphore_mem>>
    %88 = tpu.memref_squeeze %87 : memref<1x!tpu.dma_semaphore, #tpu.memory_space<semaphore_mem>> -> memref<!tpu.dma_semaphore, #tpu.memory_space<semaphore_mem>>
    tpu.wait_dma2 semaphore(%88 : memref<!tpu.dma_semaphore, #tpu.memory_space<semaphore_mem>>) src(%85 : memref<1x32xf32, #tpu.memory_space<any>>) dst(%86 : memref<1x32xf32, #tpu.memory_space<vmem>>)
    return
  }
  func.func @transform_1(%arg0: i32, %arg1: memref<16xi32, #tpu.memory_space<smem>>) -> (i32, i32) {
    %c0_i32 = arith.constant 0 : i32
    %c0_i32_0 = arith.constant 0 : i32
    return %arg0, %c0_i32 : i32, i32
  }
}

</mosaic_0001>

<bundles_post_ra>
// kernel: tpu_custom_call.1
= control target key start
LH: loop header
LB: loop body
LE: loop exit
PB: predicated region body
PF: predicated region fallthrough
CT: control target
= control target key end

     0   :  { %s731_s9 = smov [#allocation4]   ;;  %s1100_s0 = inlined_call_operand.hbm [shape: s32[16], index: 0, kind: input, shape index: {}]   ;;  %s1101_s1 = inlined_call_operand.hbm [shape: f32[32,32], index: 1, kind: input, shape index: {}]   ;;  %s1102_s2 = inlined_call_operand.hbm [shape: f32[16,32], index: 2, kind: output, shape index: {}]  }
   0x1   :  { %8 = dma.hbm_to_smem %s1100_s0, 16, %s731_s9, [#allocation3] }
   0x2   :  { %681 = dma.done.wait [#allocation3], 16 }
   0x3   :  { %682 = vsyncadd [#allocation3], 4294967280 }
   0x4   :  { %10 = sfence }
   0x5   :  { %11 = vsyncpa [#allocation6], 0 }
   0x6   :  { %13 = vsyncpa [#allocation6 + $0x1], 0  ;;  %s751_s12 = smov 0   ;;  %s753_s13 = smov 0  }
   0x7   :  { %s755_s14 = smov 0  }
   0x8 LB: > { %s331_s0 = sadd.s32 4294967295, %s729_s14   ;;  %s768_s15 = sadd.s32 1, %s729_s14   ;;  %s729_s14 = sphi %s755_s14, %s1112_s14   ;;  %s725_s13 = sphi %s753_s13, %s1111_s13   ;;  %s721_s12 = sphi %s751_s12, %s1110_s12  }
   0x9   : > { %s22_s16 = ssub.s32 %s729_s14, %s768_s15  ;;  %s25_s17 = sadd.s32 1, %s725_s13 }
   0xa   : > { %p23_p0 = scmp.eq.s32.totalorder %s22_s16, 0  ;;  %p332_p1 = scmp.ne.s32.totalorder %s22_s16, 0 }
   0xb   : > { %p29_p2 = scmp.eq.s32.totalorder %s729_s14, 1  ;;  %p34_p3 = scmp.ne.s32.totalorder %s725_s13, %s721_s12 }
   0xc   : > { %s777_s18 = scalar_select %p23_p0, %s725_s13, %s25_s17  }
   0xd   : > { %p779_p4 = por %p332_p1, %p29_p2  ;;  %p35_p5 = scmp.eq.s32.totalorder %s331_s0, 1 }
   0xe   : > { %p398_p6 = scmp.lt.s32.totalorder %s729_s14, 2  ;;  %s49_s21 = sand.u32 1, %s725_s13  }
   0xf   : > { %p784_p7 = por %p35_p5, %p34_p3  ;;  %s334_s22 = sshll.u32 %s49_s21, 3 }
  0x10   : > { %s792_s23 = sshll.u32 %s729_s14, 3  ;;  %s800_s27 = scalar_lea.vmem [#allocation5], %s334_s22 }
  0x11   : > { %s1105_s20 = scalar_select %p784_p7, 1, 0 }
  0x12   : > { %s67_s24 = sadd.s32 1, %s792_s23  ;;  %s63_s28 = sshll.u32 %s800_s27, 4  ;;  %s804_s28 = int_to_ptr.vmem [resolvable:$true] %s63_s28 }
  0x13   : > { %s359_s25 = scalar_select %p398_p6, [#allocation4], [#allocation25] }
  0x14   : > { %s360_s26 = scalar_select %p398_p6, %s792_s23, 0 }
  0x15   : > { %s71_s29 = scalar_lea.vmem %s800_s27, 1 [#allocation5]  ;;  %s1114_s24 = smov (!%p398_p6, %s67_s24), 0 }
  0x16   : > { %s53_s30 = sld [smem:[%s359_s25 + %s360_s26]]  ;;  %s80_s4 = sshll.u32 %s71_s29, 4  ;;  %s813_s4 = int_to_ptr.vmem [resolvable:$true] %s80_s4 }
  0x17   : > { %s362_s3 = scalar_select %p398_p6, [#allocation4], [#allocation26] }
  0x18   : > { %s84_s5 = sadd.s32 2, %s792_s23  ;;  %s88_s9 = scalar_lea.vmem %s800_s27, 2 [#allocation5] }
  0x19   : > { %s811_s6 = sld [smem:[%s362_s3 + %s1114_s24]]  ;;  %s97_s16 = sshll.u32 %s88_s9, 4  ;;  %s857_s16 = int_to_ptr.vmem [resolvable:$true] %s97_s16 }
  0x1a   : > { %s817_s7 = scalar_select %p398_p6, [#allocation4], [#allocation27] }
  0x1b   : > { %s828_s25 = scalar_lea.hbm %s1101_s1, 512 }
  0x1c   : > { %s336_s8 = sshll.u32 %s53_s30, 4 }
  0x1d   : > { %s55_s0 = scalar_lea.hbm %s1101_s1, %s336_s8 }
  0x1e   : > { %s433_s17 = scalar_lea.hbm %s55_s0, 16  ;;  %p438_p11 = scmp.lt.s32.totalorder %s55_s0, %s1101_s1 }
  0x1f   : > { %p434_p8 = scmp.ne.s32.totalorder %s55_s0, %s433_s17  ;;  %p439_p12 = scmp.lt.s32.totalorder %s828_s25, %s433_s17 }
  0x21   : > { %p435_p9 = pnand %p434_p8, %p398_p6  ;;  %p440_p13 = por %p439_p12, %p438_p11 }
  0x23   : > { %p436_p10 = pneg %p435_p9 }
  0x25   : > { %p441_p0 = pnand %p440_p13, %p436_p10 }
  0x27   : > { %444 = shalt.err (!%p441_p0)  }
  0x28   : > { %s445_s30 = scalar_lea.vmem %s804_s28, 16  ;;  %s732_s3 = smov [#allocation5]  }
  0x29   : > { %p446_p1 = scmp.ne.s32.totalorder %s804_s28, %s445_s30  ;;  %s449_s8 = sshll.u32 %s732_s3, 4  ;;  %s838_s8 = int_to_ptr.vmem [resolvable:$false] %s449_s8 }
  0x2a   : > { %s841_s9 = scalar_lea.vmem %s838_s8, 256  ;;  %p1103_p5 = scmp.lt.s32.totalorder %s804_s28, %s838_s8 }
  0x2b   : > { %p447_p2 = pnand %p446_p1, %p398_p6  ;;  %p453_p8 = scmp.lt.s32.totalorder %s841_s9, %s445_s30 }
  0x2d   : > { %p448_p3 = pneg %p447_p2  ;;  %p454_p9 = por %p453_p8, %p1103_p5 }
  0x2f   : > { %p455_p10 = pnand %p454_p9, %p448_p3 }
  0x31   : > { %458 = shalt.err (!%p455_p10)  }
  0x32   : > { %361 = dma.hbm_to_vmem [thread:$0]  (%p398_p6), %s55_s0, 16, %s804_s28, [#allocation2] }
  0x33   : > { %s1116_s5 = smov (!%p398_p6, %s84_s5), 0  ;;  %s337_s10 = sshll.u32 %s811_s6, 4 }
  0x34   : > { %s70_s22 = scalar_lea.hbm %s1101_s1, %s337_s10  ;;  %s863_s24 = sld [smem:[%s817_s7 + %s1116_s5]] }
  0x35   : > { %s459_s26 = scalar_lea.hbm %s70_s22, 16  ;;  %p464_p0 = scmp.lt.s32.totalorder %s70_s22, %s1101_s1 }
  0x36   : > { %p460_p11 = scmp.ne.s32.totalorder %s70_s22, %s459_s26  ;;  %p465_p1 = scmp.lt.s32.totalorder %s828_s25, %s459_s26 }
  0x38   : > { %p461_p12 = pnand %p460_p11, %p398_p6  ;;  %p466_p2 = por %p465_p1, %p464_p0 }
  0x3a   : > { %p462_p13 = pneg %p461_p12 }
  0x3c   : > { %p467_p3 = pnand %p466_p2, %p462_p13 }
  0x3e   : > { %470 = shalt.err (!%p467_p3)  }
  0x3f   : > { %s471_s5 = scalar_lea.vmem %s813_s4, 16  ;;  %p478_p11 = scmp.lt.s32.totalorder %s813_s4, %s838_s8 }
  0x40   : > { %p472_p8 = scmp.ne.s32.totalorder %s813_s4, %s471_s5  ;;  %p479_p12 = scmp.lt.s32.totalorder %s841_s9, %s471_s5 }
  0x42   : > { %p473_p9 = pnand %p472_p8, %p398_p6  ;;  %p480_p5 = por %p479_p12, %p478_p11 }
  0x44   : > { %p474_p10 = pneg %p473_p9 }
  0x46   : > { %p481_p7 = pnand %p480_p5, %p474_p10 }
  0x48   : > { %484 = shalt.err (!%p481_p7)  }
  0x49   : > { %364 = dma.hbm_to_vmem [thread:$0]  (%p398_p6), %s70_s22, 16, %s813_s4, [#allocation2 + $0x1] }
  0x4a   : > { %s101_s6 = sadd.s32 3, %s792_s23  ;;  %s105_s7 = scalar_lea.vmem %s800_s27, 3 [#allocation5] }
  0x4b   : > { %s368_s0 = scalar_select %p398_p6, [#allocation4], [#allocation28] }
  0x4c   : > { %s1118_s6 = smov (!%p398_p6, %s101_s6), 0  ;;  %s114_s3 = sshll.u32 %s105_s7, 4  ;;  %s894_s3 = int_to_ptr.vmem [resolvable:$true] %s114_s3 }
  0x4d   : > { %s118_s10 = sadd.s32 4, %s792_s23  ;;  %s338_s11 = sshll.u32 %s863_s24, 4 }
  0x4e   : > { %s889_s17 = sld [smem:[%s368_s0 + %s1118_s6]]  ;;  %s87_s30 = scalar_lea.hbm %s1101_s1, %s338_s11 }
  0x4f   : > { %s485_s5 = scalar_lea.hbm %s87_s30, 16  ;;  %p490_p0 = scmp.lt.s32.totalorder %s87_s30, %s1101_s1 }
  0x50   : > { %p486_p7 = scmp.ne.s32.totalorder %s87_s30, %s485_s5  ;;  %p491_p1 = scmp.lt.s32.totalorder %s828_s25, %s485_s5 }
  0x52   : > { %p487_p5 = pnand %p486_p7, %p398_p6  ;;  %p492_p2 = por %p491_p1, %p490_p0 }
  0x54   : > { %p488_p13 = pneg %p487_p5 }
  0x56   : > { %p493_p3 = pnand %p492_p2, %p488_p13 }
  0x58   : > { %496 = shalt.err (!%p493_p3)  }
  0x59   : > { %s497_s24 = scalar_lea.vmem %s857_s16, 16  ;;  %p504_p11 = scmp.lt.s32.totalorder %s857_s16, %s838_s8 }
  0x5a   : > { %p498_p8 = scmp.ne.s32.totalorder %s857_s16, %s497_s24  ;;  %p505_p12 = scmp.lt.s32.totalorder %s841_s9, %s497_s24 }
  0x5c   : > { %p499_p9 = pnand %p498_p8, %p398_p6  ;;  %p506_p7 = por %p505_p12, %p504_p11 }
  0x5e   : > { %p500_p10 = pneg %p499_p9 }
  0x60   : > { %p507_p5 = pnand %p506_p7, %p500_p10 }
  0x62   : > { %510 = shalt.err (!%p507_p5)  }
  0x63   : > { %367 = dma.hbm_to_vmem [thread:$0]  (%p398_p6), %s87_s30, 16, %s857_s16, [#allocation2 + $0x2] }
  0x64   : > { %s371_s6 = scalar_select %p398_p6, [#allocation4], [#allocation29] }
  0x65   : > { %s1120_s10 = smov (!%p398_p6, %s118_s10), 0  ;;  %s122_s7 = scalar_lea.vmem %s800_s27, 4 [#allocation5] }
  0x66   : > { %s135_s0 = sadd.s32 5, %s792_s23  ;;  %s339_s11 = sshll.u32 %s889_s17, 4 }
  0x67   : > { %s919_s26 = sld [smem:[%s371_s6 + %s1120_s10]]  ;;  %s104_s4 = scalar_lea.hbm %s1101_s1, %s339_s11 }
  0x68   : > { %s131_s22 = sshll.u32 %s122_s7, 4  ;;  %s511_s24 = scalar_lea.hbm %s104_s4, 16  ;;  %s132_s22 = int_to_ptr.vmem [resolvable:$true] %s131_s22 }
  0x69   : > { %p512_p13 = scmp.ne.s32.totalorder %s104_s4, %s511_s24  ;;  %p516_p2 = scmp.lt.s32.totalorder %s104_s4, %s1101_s1 }
  0x6a   : > { %p517_p3 = scmp.lt.s32.totalorder %s828_s25, %s511_s24 }
  0x6b   : > { %p513_p0 = pnand %p512_p13, %p398_p6 }
  0x6c   : > { %p518_p8 = por %p517_p3, %p516_p2 }
  0x6d   : > { %p514_p1 = pneg %p513_p0 }
  0x6f   : > { %p519_p9 = pnand %p518_p8, %p514_p1 }
  0x71   : > { %522 = shalt.err (!%p519_p9)  }
  0x72   : > { %s523_s10 = scalar_lea.vmem %s894_s3, 16  ;;  %p530_p7 = scmp.lt.s32.totalorder %s894_s3, %s838_s8 }
  0x73   : > { %p524_p10 = scmp.ne.s32.totalorder %s894_s3, %s523_s10  ;;  %p531_p5 = scmp.lt.s32.totalorder %s841_s9, %s523_s10 }
  0x75   : > { %p525_p11 = pnand %p524_p10, %p398_p6  ;;  %p532_p13 = por %p531_p5, %p530_p7 }
  0x77   : > { %p526_p12 = pneg %p525_p11 }
  0x79   : > { %p533_p0 = pnand %p532_p13, %p526_p12 }
  0x7b   : > { %536 = shalt.err (!%p533_p0)  }
  0x7c   : > { %370 = dma.hbm_to_vmem [thread:$0]  (%p398_p6), %s104_s4, 16, %s894_s3, [#allocation2 + $0x3] }
  0x7d   : > { %s139_s17 = scalar_lea.vmem %s800_s27, 5 [#allocation5]  ;;  %s1122_s0 = smov (!%p398_p6, %s135_s0), 0 }
  0x7e   : > { %s374_s6 = scalar_select %p398_p6, [#allocation4], [#allocation30] }
  0x7f   : > { %s340_s7 = sshll.u32 %s919_s26, 4  ;;  %s148_s11 = sshll.u32 %s139_s17, 4  ;;  %s149_s11 = int_to_ptr.vmem [resolvable:$true] %s148_s11 }
  0x80   : > { %s121_s24 = scalar_lea.hbm %s1101_s1, %s340_s7  ;;  %s949_s16 = sld [smem:[%s374_s6 + %s1122_s0]] }
  0x81   : > { %s537_s30 = scalar_lea.hbm %s121_s24, 16  ;;  %p542_p8 = scmp.lt.s32.totalorder %s121_s24, %s1101_s1 }
  0x82   : > { %p538_p1 = scmp.ne.s32.totalorder %s121_s24, %s537_s30  ;;  %p543_p9 = scmp.lt.s32.totalorder %s828_s25, %s537_s30 }
  0x84   : > { %p539_p2 = pnand %p538_p1, %p398_p6  ;;  %p544_p10 = por %p543_p9, %p542_p8 }
  0x86   : > { %p540_p3 = pneg %p539_p2 }
  0x88   : > { %p545_p11 = pnand %p544_p10, %p540_p3 }
  0x8a   : > { %548 = shalt.err (!%p545_p11)  }
  0x8b   : > { %s549_s26 = scalar_lea.vmem %s132_s22, 16  ;;  %p556_p13 = scmp.lt.s32.totalorder %s132_s22, %s838_s8 }
  0x8c   : > { %p550_p12 = scmp.ne.s32.totalorder %s132_s22, %s549_s26  ;;  %p557_p0 = scmp.lt.s32.totalorder %s841_s9, %s549_s26 }
  0x8e   : > { %p551_p7 = pnand %p550_p12, %p398_p6  ;;  %p558_p1 = por %p557_p0, %p556_p13 }
  0x90   : > { %p552_p5 = pneg %p551_p7 }
  0x92   : > { %p559_p2 = pnand %p558_p1, %p552_p5 }
  0x94   : > { %562 = shalt.err (!%p559_p2)  }
  0x95   : > { %373 = dma.hbm_to_vmem [thread:$0]  (%p398_p6), %s121_s24, 16, %s132_s22, [#allocation2 + $0x4] }
  0x96   : > { %s152_s0 = sadd.s32 6, %s792_s23  ;;  %s156_s17 = scalar_lea.vmem %s800_s27, 6 [#allocation5] }
  0x97   : > { %s377_s10 = scalar_select %p398_p6, [#allocation4], [#allocation31] }
  0x98   : > { %s1124_s0 = smov (!%p398_p6, %s152_s0), 0  ;;  %s169_s6 = sadd.s32 7, %s792_s23 }
  0x99   : > { %s341_s7 = sshll.u32 %s949_s16, 4  ;;  %s153_s29 = sld [smem:[%s377_s10 + %s1124_s0]] }
  0x9a   : > { %s138_s3 = scalar_lea.hbm %s1101_s1, %s341_s7  ;;  %s165_s4 = sshll.u32 %s156_s17, 4  ;;  %s166_s4 = int_to_ptr.vmem [resolvable:$true] %s165_s4 }
  0x9b   : > { %s563_s26 = scalar_lea.hbm %s138_s3, 16  ;;  %p568_p10 = scmp.lt.s32.totalorder %s138_s3, %s1101_s1 }
  0x9c   : > { %p564_p3 = scmp.ne.s32.totalorder %s138_s3, %s563_s26  ;;  %p569_p11 = scmp.lt.s32.totalorder %s828_s25, %s563_s26 }
  0x9e   : > { %p565_p8 = pnand %p564_p3, %p398_p6  ;;  %p570_p12 = por %p569_p11, %p568_p10 }
  0xa0   : > { %p566_p9 = pneg %p565_p8 }
  0xa2   : > { %p571_p7 = pnand %p570_p12, %p566_p9 }
  0xa4   : > { %574 = shalt.err (!%p571_p7)  }
  0xa5   : > { %s575_s23 = scalar_lea.vmem %s149_s11, 16  ;;  %p582_p1 = scmp.lt.s32.totalorder %s149_s11, %s838_s8 }
  0xa6   : > { %p576_p5 = scmp.ne.s32.totalorder %s149_s11, %s575_s23  ;;  %p583_p2 = scmp.lt.s32.totalorder %s841_s9, %s575_s23 }
  0xa8   : > { %p577_p13 = pnand %p576_p5, %p398_p6  ;;  %p584_p3 = por %p583_p2, %p582_p1 }
  0xaa   : > { %p578_p0 = pneg %p577_p13 }
  0xac   : > { %p585_p8 = pnand %p584_p3, %p578_p0 }
  0xae   : > { %588 = shalt.err (!%p585_p8)  }
  0xaf   : > { %376 = dma.hbm_to_vmem [thread:$0]  (%p398_p6), %s138_s3, 16, %s149_s11, [#allocation2 + $0x5] }
  0xb0   : > { %s380_s16 = scalar_select %p398_p6, [#allocation4], [#allocation32] }
  0xb1   : > { %s1126_s6 = smov (!%p398_p6, %s169_s6), 0  ;;  %s342_s0 = sshll.u32 %s153_s29, 4 }
  0xb2   : > { %s173_s10 = scalar_lea.vmem %s800_s27, 7 [#allocation5]  ;;  %s155_s5 = scalar_lea.hbm %s1101_s1, %s342_s0 }
  0xb3   : > { %s170_s30 = sld [smem:[%s380_s16 + %s1126_s6]]  ;;  %s589_s26 = scalar_lea.hbm %s155_s5, 16 }
  0xb4   : > { %p590_p9 = scmp.ne.s32.totalorder %s155_s5, %s589_s26  ;;  %p594_p12 = scmp.lt.s32.totalorder %s155_s5, %s1101_s1 }
  0xb5   : > { %p595_p7 = scmp.lt.s32.totalorder %s828_s25, %s589_s26 }
  0xb6   : > { %p591_p10 = pnand %p590_p9, %p398_p6 }
  0xb7   : > { %p596_p5 = por %p595_p7, %p594_p12 }
  0xb8   : > { %p592_p11 = pneg %p591_p10 }
  0xba   : > { %p597_p13 = pnand %p596_p5, %p592_p11 }
  0xbc   : > { %600 = shalt.err (!%p597_p13)  }
  0xbd   : > { %s601_s11 = scalar_lea.vmem %s166_s4, 16  ;;  %p608_p3 = scmp.lt.s32.totalorder %s166_s4, %s838_s8 }
  0xbe   : > { %p602_p0 = scmp.ne.s32.totalorder %s166_s4, %s601_s11  ;;  %p609_p8 = scmp.lt.s32.totalorder %s841_s9, %s601_s11 }
  0xc0   : > { %p603_p1 = pnand %p602_p0, %p398_p6  ;;  %p610_p9 = por %p609_p8, %p608_p3 }
  0xc2   : > { %p604_p2 = pneg %p603_p1 }
  0xc4   : > { %p611_p10 = pnand %p610_p9, %p604_p2 }
  0xc6   : > { %614 = shalt.err (!%p611_p10)  }
  0xc7   : > { %379 = dma.hbm_to_vmem [thread:$0]  (%p398_p6), %s155_s5, 16, %s166_s4, [#allocation2 + $0x6] }
  0xc8   : > { %s182_s27 = sshll.u32 %s173_s10, 4  ;;  %s343_s6 = sshll.u32 %s170_s30, 4  ;;  %s183_s27 = int_to_ptr.vmem [resolvable:$true] %s182_s27 }
  0xc9   : > { %s172_s23 = scalar_lea.hbm %s1101_s1, %s343_s6 }
  0xca   : > { %s615_s16 = scalar_lea.hbm %s172_s23, 16  ;;  %p620_p5 = scmp.lt.s32.totalorder %s172_s23, %s1101_s1 }
  0xcb   : > { %p616_p11 = scmp.ne.s32.totalorder %s172_s23, %s615_s16  ;;  %p621_p13 = scmp.lt.s32.totalorder %s828_s25, %s615_s16 }
  0xcd   : > { %p617_p12 = pnand %p616_p11, %p398_p6  ;;  %p622_p0 = por %p621_p13, %p620_p5 }
  0xcf   : > { %p618_p7 = pneg %p617_p12 }
  0xd1   : > { %p623_p1 = pnand %p622_p0, %p618_p7 }
  0xd3   : > { %626 = shalt.err (!%p623_p1)  }
  0xd4   : > { %s627_s4 = scalar_lea.vmem %s183_s27, 16  ;;  %p634_p9 = scmp.lt.s32.totalorder %s183_s27, %s838_s8 }
  0xd5   : > { %p628_p2 = scmp.ne.s32.totalorder %s183_s27, %s627_s4  ;;  %p635_p10 = scmp.lt.s32.totalorder %s841_s9, %s627_s4 }
  0xd7   : > { %p629_p3 = pnand %p628_p2, %p398_p6  ;;  %p636_p11 = por %p635_p10, %p634_p9 }
  0xd9   : > { %p630_p8 = pneg %p629_p3 }
  0xdb   : > { %p637_p12 = pnand %p636_p11, %p630_p8 }
  0xdd   : > { %640 = shalt.err (!%p637_p12)  }
  0xde   : > { %382 = dma.hbm_to_vmem [thread:$0]  (%p398_p6), %s172_s23, 16, %s183_s27, [#allocation2 + $0x7] }
  0xdf   : > { %684 = dma.done.wait (%p398_p6), [#allocation2], 16 }
  0xe0   : > { %686 = vsyncadd (%p398_p6), [#allocation2], 4294967280 }
  0xe1   : > { %688 = dma.done.wait (%p398_p6), [#allocation2 + $0x1], 16 }
  0xe2   : > { %690 = vsyncadd (%p398_p6), [#allocation2 + $0x1], 4294967280 }
  0xe3   : > { %692 = dma.done.wait (%p398_p6), [#allocation2 + $0x2], 16 }
  0xe4   : > { %694 = vsyncadd (%p398_p6), [#allocation2 + $0x2], 4294967280 }
  0xe5   : > { %696 = dma.done.wait (%p398_p6), [#allocation2 + $0x3], 16 }
  0xe6   : > { %698 = vsyncadd (%p398_p6), [#allocation2 + $0x3], 4294967280 }
  0xe7   : > { %700 = dma.done.wait (%p398_p6), [#allocation2 + $0x4], 16 }
  0xe8   : > { %702 = vsyncadd (%p398_p6), [#allocation2 + $0x4], 4294967280 }
  0xe9   : > { %704 = dma.done.wait (%p398_p6), [#allocation2 + $0x5], 16 }
  0xea   : > { %706 = vsyncadd (%p398_p6), [#allocation2 + $0x5], 4294967280 }
  0xeb   : > { %708 = dma.done.wait (%p398_p6), [#allocation2 + $0x6], 16 }
  0xec   : > { %710 = vsyncadd (%p398_p6), [#allocation2 + $0x6], 4294967280 }
  0xed   : > { %712 = dma.done.wait (%p398_p6), [#allocation2 + $0x7], 16 }
  0xee   : > { %714 = vsyncadd (%p398_p6), [#allocation2 + $0x7], 4294967280  ;;  %s345_s25 = sshll.u32 %s729_s14, 7  ;;  %p1061_p7 = pnand %p398_p6, %p779_p4 }
  0xef   : > { %s215_s5 = scalar_lea.hbm %s1102_s2, %s345_s25  ;;  %s229_s26 = sand.u32 1, %s721_s12  }
  0xf0   : > { %s204_s22 = scalar_lea.sflag [#allocation6], %s49_s21  ;;  %s641_s24 = scalar_lea.vmem %s804_s28, 128 }
  0xf1   : > { %p642_p13 = scmp.ne.s32.totalorder %s804_s28, %s641_s24  ;;  %p643_p0 = pneg %p1061_p7 }
  0xf2   : > { %p650_p3 = scmp.lt.s32.totalorder %s841_s9, %s641_s24  ;;  %p1107_p8 = scmp.lt.s32.totalorder %s804_s28, %s838_s8 }
  0xf3   : > { %p644_p1 = pnand %p643_p0, %p642_p13 }
  0xf4   : > { %p651_p9 = por %p650_p3, %p1107_p8 }
  0xf5   : > { %p645_p2 = pneg %p644_p1 }
  0xf7   : > { %p652_p10 = pnand %p651_p9, %p645_p2 }
  0xf9   : > { %655 = shalt.err (!%p652_p10)
}
  0xfa   : > { %s656_s19 = scalar_lea.hbm %s215_s5, 128  ;;  %s661_s12 = scalar_lea.hbm %s1102_s2, 256 }
  0xfb   : > { %p657_p4 = scmp.ne.s32.totalorder %s215_s5, %s656_s19  ;;  %p662_p12 = scmp.lt.s32.totalorder %s215_s5, %s1102_s2 }
  0xfc   : > { %p663_p5 = scmp.lt.s32.totalorder %s661_s12, %s656_s19 }
  0xfd   : > { %p659_p6 = pnand %p657_p4, %p643_p0 }
  0xfe   : > { %p664_p13 = por %p663_p5, %p662_p12 }
  0xff   : > { %p660_p11 = pneg %p659_p6 }
 0x101   : > { %p665_p1 = pnand %p664_p13, %p660_p11 }
 0x103   : > { %668 = shalt.err (!%p665_p1)
}
 0x104   : > { %393 = dma.vmem_to_hbm [thread:$0]  (!%p1061_p7), %s804_s28, 128, %s215_s5, %s204_s22  }
 0x105   : > { %p1108_p0 = scmp.ne.s32.totalorder %s1105_s20, 0  ;;  %p1109_p2 = scmp.ge.s32.totalorder %s729_s14, 1 }
 0x106   : > { %s230_s8 = scalar_lea.sflag [#allocation6], %s229_s26 }
 0x107   : > { %p395_p3 = pnand %p1109_p2, %p1108_p0 }
 0x109   : > { %p396_p8 = pneg %p395_p3 }
 0x10b   : > { %716 = dma.done.wait (%p396_p8), %s230_s8, 128  }
 0x10c   : > { %718 = vsyncadd (%p396_p8), %s230_s8, 4294967168  ;;  %p16_p5 = scmp.ge.s32.totalorder %s768_s15, 3   ;;  %s1110_s12 = smov %s725_s13 }
 0x10d   : > { %s1111_s13 = smov %s777_s18  ;;  %s1112_s14 = smov %s768_s15 }
 0x10e   :  { %18 = sbr.rel (!%p16_p5) target bundleno = 8 (0x8), region = 105 }
 0x113   :  { %235 = vsyncpa [#allocation6], 1 }
 0x114   :  { %237 = vsyncpa [#allocation6 + $0x1], 1 }
 0x115   :  { %238 = vsyncmov [#allocation2] }
 0x118   :  { %s239_s14 = vpop.sfrf %238 }
 0x119   :  { %p348_p7 = scmp.ne.s32.totalorder %s239_s14, 0 }
 0x11b   :  { %243 = shalt.err (%p348_p7)  }
 0x11c   :  { %245 = vsyncmov [#allocation2 + $0x1] }
 0x11f   :  { %s246_s20 = vpop.sfrf %245 }
 0x120   :  { %p349_p9 = scmp.ne.s32.totalorder %s246_s20, 0 }
 0x122   :  { %250 = shalt.err (%p349_p9)  }
 0x123   :  { %252 = vsyncmov [#allocation2 + $0x2] }
 0x126   :  { %s253_s28 = vpop.sfrf %252 }
 0x127   :  { %p350_p10 = scmp.ne.s32.totalorder %s253_s28, 0 }
 0x129   :  { %257 = shalt.err (%p350_p10)  }
 0x12a   :  { %259 = vsyncmov [#allocation2 + $0x3] }
 0x12d   :  { %s260_s9 = vpop.sfrf %259 }
 0x12e   :  { %p351_p4 = scmp.ne.s32.totalorder %s260_s9, 0 }
 0x130   :  { %264 = shalt.err (%p351_p4)  }
 0x131   :  { %266 = vsyncmov [#allocation2 + $0x4] }
 0x134   :  { %s267_s15 = vpop.sfrf %266 }
 0x135   :  { %p352_p6 = scmp.ne.s32.totalorder %s267_s15, 0 }
 0x137   :  { %271 = shalt.err (%p352_p6)  }
 0x138   :  { %273 = vsyncmov [#allocation2 + $0x5] }
 0x13b   :  { %s274_s1 = vpop.sfrf %273 }
 0x13c   :  { %p353_p11 = scmp.ne.s32.totalorder %s274_s1, 0 }
 0x13e   :  { %278 = shalt.err (%p353_p11)  }
 0x13f   :  { %280 = vsyncmov [#allocation2 + $0x6] }
 0x142   :  { %s281_s2 = vpop.sfrf %280 }
 0x143   :  { %p354_p12 = scmp.ne.s32.totalorder %s281_s2, 0 }
 0x145   :  { %285 = shalt.err (%p354_p12)  }
 0x146   :  { %287 = vsyncmov [#allocation2 + $0x7] }
 0x149   :  { %s288_s13 = vpop.sfrf %287 }
 0x14a   :  { %p355_p13 = scmp.ne.s32.totalorder %s288_s13, 0 }
 0x14c   :  { %292 = shalt.err (%p355_p13)  }

</bundles_post_ra>
